<compile_context>
chip_gen: v6e
topology: v6e:2x2x1
jax: 0.10.0
libtpu: 0.0.40
codegen_flags: <defaults>
</compile_context>

<pallas_src>
import functools

import jax
import jax.numpy as jnp
from jax import lax
from jax.experimental import pallas as pl
from jax.experimental.pallas import tpu as pltpu

# --- model hyperparameters (small, consistent with the module) ---
B = 2            # batch
T = 8            # sequence length (<= BLOCK_SIZE = 64)
C = 32           # n_embd
N_HEAD = 4
HS = C // N_HEAD # head_size = 8
HID = 4 * C      # feed-forward hidden = 128
EPS = 1e-5       # torch.nn.LayerNorm default eps
NEG_INF = -1e30  # finite mask value (avoids inf-inf NaN hazards)


def _layernorm(v, g, b):
    mu = jnp.mean(v, axis=-1, keepdims=True)
    var = jnp.mean((v - mu) ** 2, axis=-1, keepdims=True)
    return (v - mu) * lax.rsqrt(var + EPS) * g + b


def block_kernel(x_ref, ln1_g_ref, ln1_b_ref,
                 wqkv_h_ref, wp_ref, bp_ref,
                 ln2_g_ref, ln2_b_ref,
                 w1_ref, b1_ref, w2_ref, b2_ref,
                 out_ref, *, n_head):
    f32, bf16 = jnp.float32, jnp.bfloat16

    x = x_ref[...]                                 # (T, C) f32 — one sequence per grid step
    t, c = x.shape
    hs = c // n_head

    # ---- self-attention branch: sa(ln1(x)) ----
    h = _layernorm(x, ln1_g_ref[...], ln1_b_ref[...])            # (T, C) f32
    hb = h.astype(bf16)

    # Head-batched Q/K/V in one batched matmul against (3*nh, C, hs) weights:
    # no lane slicing / stacking of a (T, 3C) QKV output.
    h_bcast = jnp.broadcast_to(hb, (3 * n_head, t, c))            # (3nh, T, C)
    qkv_h = lax.dot_general(h_bcast, wqkv_h_ref[...],
                            (((2,), (1,)), ((0,), (0,))),
                            preferred_element_type=f32)           # (3nh, T, hs)
    q = qkv_h[0 * n_head:1 * n_head].astype(bf16)                 # (nh, T, hs)
    k = qkv_h[1 * n_head:2 * n_head].astype(bf16)
    v = qkv_h[2 * n_head:3 * n_head].astype(bf16)

    # Per-head causal scores for ONE sequence (no cross-sequence masked work).
    s = lax.dot_general(q, k, (((2,), (2,)), ((0,), (0,))),
                        preferred_element_type=f32)               # (nh, T, T)
    s = s * (hs ** -0.5)
    rid = lax.broadcasted_iota(jnp.int32, (t, t), 0)
    cid = lax.broadcasted_iota(jnp.int32, (t, t), 1)
    s = jnp.where(rid >= cid, s, NEG_INF)                         # fused causal mask
    s = s - jnp.max(s, axis=-1, keepdims=True)                    # kept for overflow safety
    p = jnp.exp(s)
    p = p * pl.reciprocal(jnp.sum(p, axis=-1, keepdims=True))     # exact reciprocal
    # TODO(synk): attention-weight dropout omitted (identity at inference).

    o = lax.dot_general(p.astype(bf16), v,
                        (((2,), (1,)), ((0,), (0,))),
                        preferred_element_type=f32)               # (nh, T, hs)

    # Single lane concat of per-head outputs, then ONE (T, C) @ (C, C) projection.
    o_rows = jnp.concatenate([o[i] for i in range(n_head)], axis=-1)   # (T, C)
    sa = jnp.dot(o_rows.astype(bf16), wp_ref[...],
                 preferred_element_type=f32) + bp_ref[...]
    # TODO(synk): post-projection dropout omitted (identity at inference).
    x1 = x + sa                                                   # residual 1

    # ---- feed-forward branch: ff(ln2(x1)) ----
    h2 = _layernorm(x1, ln2_g_ref[...], ln2_b_ref[...])
    ff = jnp.dot(h2.astype(bf16), w1_ref[...],
                 preferred_element_type=f32) + b1_ref[...]
    ff = jnp.maximum(ff, 0.0)
    ff = jnp.dot(ff.astype(bf16), w2_ref[...],
                 preferred_element_type=f32) + b2_ref[...]
    # TODO(synk): feed-forward dropout omitted (identity at inference).

    out_ref[...] = (x1 + ff).astype(out_ref.dtype)                # residual 2


def prepare_block_params(params):
    """One-time, call-site-hoisted weight prep (head split + bf16 casts)."""
    (ln1_g, ln1_b, wq, wk, wv, wp, bp, ln2_g, ln2_b, w1, b1, w2, b2) = params
    c = wq.shape[0]
    hs = c // N_HEAD
    # (3*nh, C, hs): per-head Q/K/V weights, head-major, bf16.
    wqkv_h = jnp.stack(
        [w[:, i * hs:(i + 1) * hs] for w in (wq, wk, wv) for i in range(N_HEAD)],
        axis=0).astype(jnp.bfloat16)
    return (ln1_g, ln1_b, wqkv_h, wp.astype(jnp.bfloat16), bp,
            ln2_g, ln2_b, w1.astype(jnp.bfloat16), b1,
            w2.astype(jnp.bfloat16), b2)


@jax.jit
def block_forward(x, prep):
    (ln1_g, ln1_b, wqkv_h, wp, bp, ln2_g, ln2_b, w1, b1, w2, b2) = prep
    b, t, c = x.shape
    x2d = x.reshape(b * t, c)

    row_spec = pl.BlockSpec((t, c), lambda i: (i, 0))

    def full_spec(a):
        if a.ndim == 3:
            return pl.BlockSpec(a.shape, lambda i: (0, 0, 0))
        return pl.BlockSpec(a.shape, lambda i: (0, 0))

    in_specs = [row_spec,
                full_spec(ln1_g), full_spec(ln1_b),
                full_spec(wqkv_h), full_spec(wp), full_spec(bp),
                full_spec(ln2_g), full_spec(ln2_b),
                full_spec(w1), full_spec(b1), full_spec(w2), full_spec(b2)]

    out2d = pl.pallas_call(
        functools.partial(block_kernel, n_head=N_HEAD),
        out_shape=jax.ShapeDtypeStruct((b * t, c), x.dtype),
        grid=(b,),
        in_specs=in_specs,
        out_specs=row_spec,
        compiler_params=pltpu.CompilerParams(
            dimension_semantics=("parallel",)),
    )(x2d, ln1_g, ln1_b, wqkv_h, wp, bp, ln2_g, ln2_b, w1, b1, w2, b2)
    return out2d.reshape(b, t, c)


# ----------------- pure-JAX reference (for correctness check) -----------------
def block_reference(x, params):
    (ln1_g, ln1_b, wq, wk, wv, wp, bp, ln2_g, ln2_b, w1, b1, w2, b2) = params

    def ln(v, g, b):
        mu = jnp.mean(v, axis=-1, keepdims=True)
        var = jnp.mean((v - mu) ** 2, axis=-1, keepdims=True)
        return (v - mu) / jnp.sqrt(var + EPS) * g + b

    h = ln(x, ln1_g, ln1_b)
    q = h @ wq
    k = h @ wk
    v = h @ wv
    qh = q.reshape(B, T, N_HEAD, HS).transpose(0, 2, 1, 3)
    kh = k.reshape(B, T, N_HEAD, HS).transpose(0, 2, 1, 3)
    vh = v.reshape(B, T, N_HEAD, HS).transpose(0, 2, 1, 3)
    s = jnp.einsum('bhtd,bhsd->bhts', qh, kh) * HS ** -0.5
    mask = jnp.tril(jnp.ones((T, T), dtype=bool))
    s = jnp.where(mask, s, -jnp.inf)
    p = jax.nn.softmax(s, axis=-1)
    o = jnp.einsum('bhts,bhsd->bhtd', p, vh)
    o = o.transpose(0, 2, 1, 3).reshape(B, T, C)
    sa = o @ wp + bp
    x1 = x + sa
    h2 = ln(x1, ln2_g, ln2_b)
    ff = jnp.maximum(h2 @ w1 + b1, 0.0) @ w2 + b2
    return x1 + ff


def make_params(key):
    ks = jax.random.split(key, 16)
    scale = 0.02
    ln1_g = jnp.ones((1, C), jnp.float32)
    ln1_b = jnp.zeros((1, C), jnp.float32)
    wq = scale * jax.random.normal(ks[0], (C, C), jnp.float32)
    wk = scale * jax.random.normal(ks[1], (C, C), jnp.float32)
    wv = scale * jax.random.normal(ks[2], (C, C), jnp.float32)
    wp = scale * jax.random.normal(ks[3], (C, C), jnp.float32)
    bp = scale * jax.random.normal(ks[4], (1, C), jnp.float32)
    ln2_g = jnp.ones((1, C), jnp.float32)
    ln2_b = jnp.zeros((1, C), jnp.float32)
    w1 = scale * jax.random.normal(ks[5], (C, HID), jnp.float32)
    b1 = scale * jax.random.normal(ks[6], (1, HID), jnp.float32)
    w2 = scale * jax.random.normal(ks[7], (HID, C), jnp.float32)
    b2 = scale * jax.random.normal(ks[8], (1, C), jnp.float32)
    return (ln1_g, ln1_b, wq, wk, wv, wp, bp, ln2_g, ln2_b, w1, b1, w2, b2)


if __name__ == "__main__":
    key = jax.random.PRNGKey(0)
    kx, kp = jax.random.split(key)
    x = jax.random.normal(kx, (B, T, C), jnp.float32)
    params = make_params(kp)

    # One-time weight preparation (hoisted out of the forward pass).
    prep = prepare_block_params(params)

    out = block_forward(x, prep)
    out = jax.block_until_ready(out)

    ref = jax.block_until_ready(block_reference(x, params))
    assert out.shape == (B, T, C)
    # bf16 matmul operands (f32 accumulation) -> small numerical difference vs f32 ref
    assert jnp.max(jnp.abs(out - ref)) < 2e-2, "mismatch vs reference"

    print("KERNEL_OK")
</pallas_src>

<mosaic_0001>
module attributes {stable_mosaic.version = 11 : i64} {
  func.func @block_kernel(%arg0: i32, %arg1: memref<8x32xf32, #tpu.memory_space<vmem>>, %arg2: memref<1x32xf32, #tpu.memory_space<vmem>>, %arg3: memref<1x32xf32, #tpu.memory_space<vmem>>, %arg4: memref<12x32x8xbf16, #tpu.memory_space<vmem>>, %arg5: memref<32x32xbf16, #tpu.memory_space<vmem>>, %arg6: memref<1x32xf32, #tpu.memory_space<vmem>>, %arg7: memref<1x32xf32, #tpu.memory_space<vmem>>, %arg8: memref<1x32xf32, #tpu.memory_space<vmem>>, %arg9: memref<32x128xbf16, #tpu.memory_space<vmem>>, %arg10: memref<1x128xf32, #tpu.memory_space<vmem>>, %arg11: memref<128x32xbf16, #tpu.memory_space<vmem>>, %arg12: memref<1x32xf32, #tpu.memory_space<vmem>>, %arg13: memref<8x32xf32, #tpu.memory_space<vmem>>) attributes {dimension_semantics = [#tpu.dimension_semantics<parallel>], iteration_bounds = array<i64: 2>, scalar_prefetch = 0 : i64, scratch_operands = 0 : i64, tpu.core_type = #tpu.core_type<tc>, window_params = [{transform_indices = @transform_0, window_bounds = array<i64: 8, 32>}, {pipeline_mode = #tpu.pipeline_mode<synchronous>, transform_indices = @transform_1, window_bounds = array<i64: 1, 32>}, {pipeline_mode = #tpu.pipeline_mode<synchronous>, transform_indices = @transform_2, window_bounds = array<i64: 1, 32>}, {pipeline_mode = #tpu.pipeline_mode<synchronous>, transform_indices = @transform_3, window_bounds = array<i64: 12, 32, 8>}, {pipeline_mode = #tpu.pipeline_mode<synchronous>, transform_indices = @transform_4, window_bounds = array<i64: 32, 32>}, {pipeline_mode = #tpu.pipeline_mode<synchronous>, transform_indices = @transform_5, window_bounds = array<i64: 1, 32>}, {pipeline_mode = #tpu.pipeline_mode<synchronous>, transform_indices = @transform_6, window_bounds = array<i64: 1, 32>}, {pipeline_mode = #tpu.pipeline_mode<synchronous>, transform_indices = @transform_7, window_bounds = array<i64: 1, 32>}, {pipeline_mode = #tpu.pipeline_mode<synchronous>, transform_indices = @transform_8, window_bounds = array<i64: 32, 128>}, {pipeline_mode = #tpu.pipeline_mode<synchronous>, transform_indices = @transform_9, window_bounds = array<i64: 1, 128>}, {pipeline_mode = #tpu.pipeline_mode<synchronous>, transform_indices = @transform_10, window_bounds = array<i64: 128, 32>}, {pipeline_mode = #tpu.pipeline_mode<synchronous>, transform_indices = @transform_11, window_bounds = array<i64: 1, 32>}, {transform_indices = @transform_12, window_bounds = array<i64: 8, 32>}]} {
    %c0 = arith.constant 0 : index
    %c0_0 = arith.constant 0 : index
    %0 = vector.load %arg1[%c0, %c0_0] : memref<8x32xf32, #tpu.memory_space<vmem>>, vector<8x32xf32>
    %c0_1 = arith.constant 0 : index
    %c0_2 = arith.constant 0 : index
    %1 = vector.load %arg2[%c0_1, %c0_2] : memref<1x32xf32, #tpu.memory_space<vmem>>, vector<1x32xf32>
    %c0_3 = arith.constant 0 : index
    %c0_4 = arith.constant 0 : index
    %2 = vector.load %arg3[%c0_3, %c0_4] : memref<1x32xf32, #tpu.memory_space<vmem>>, vector<1x32xf32>
    %cst = arith.constant dense<0.000000e+00> : vector<8xf32>
    %3 = vector.multi_reduction <add>, %0, %cst [1] : vector<8x32xf32> to vector<8xf32>
    %4 = vector.shape_cast %3 : vector<8xf32> to vector<8x1xf32>
    %cst_5 = arith.constant 3.200000e+01 : f32
    %5 = vector.broadcast %cst_5 : f32 to vector<8x1xf32>
    %6 = arith.divf %4, %5 : vector<8x1xf32>
    %7 = vector.broadcast %6 : vector<8x1xf32> to vector<8x32xf32>
    %8 = arith.subf %0, %7 : vector<8x32xf32>
    %9 = arith.mulf %8, %8 : vector<8x32xf32>
    %cst_6 = arith.constant dense<0.000000e+00> : vector<8xf32>
    %10 = vector.multi_reduction <add>, %9, %cst_6 [1] : vector<8x32xf32> to vector<8xf32>
    %11 = vector.shape_cast %10 : vector<8xf32> to vector<8x1xf32>
    %cst_7 = arith.constant 3.200000e+01 : f32
    %12 = vector.broadcast %cst_7 : f32 to vector<8x1xf32>
    %13 = arith.divf %11, %12 : vector<8x1xf32>
    %14 = vector.broadcast %6 : vector<8x1xf32> to vector<8x32xf32>
    %15 = arith.subf %0, %14 : vector<8x32xf32>
    %cst_8 = arith.constant 9.99999974E-6 : f32
    %16 = vector.broadcast %cst_8 : f32 to vector<8x1xf32>
    %17 = arith.addf %13, %16 : vector<8x1xf32>
    %18 = math.rsqrt %17 : vector<8x1xf32>
    %19 = vector.broadcast %18 : vector<8x1xf32> to vector<8x32xf32>
    %20 = arith.mulf %15, %19 : vector<8x32xf32>
    %21 = vector.broadcast %1 : vector<1x32xf32> to vector<8x32xf32>
    %22 = arith.mulf %20, %21 : vector<8x32xf32>
    %23 = vector.broadcast %2 : vector<1x32xf32> to vector<8x32xf32>
    %24 = arith.addf %22, %23 : vector<8x32xf32>
    %25 = arith.truncf %24 : vector<8x32xf32> to vector<8x32xbf16>
    %26 = vector.shape_cast %25 : vector<8x32xbf16> to vector<1x8x32xbf16>
    %27 = vector.broadcast %26 : vector<1x8x32xbf16> to vector<12x8x32xbf16>
    %c0_9 = arith.constant 0 : index
    %c0_10 = arith.constant 0 : index
    %c0_11 = arith.constant 0 : index
    %28 = vector.load %arg4[%c0_9, %c0_10, %c0_11] : memref<12x32x8xbf16, #tpu.memory_space<vmem>>, vector<12x32x8xbf16>
    %cst_12 = arith.constant dense<0.000000e+00> : vector<12x8x8xf32>
    %29 = tpu.matmul %27, %28, %cst_12 {dimension_numbers = #tpu.dot_dimension_numbers<[2], [1], [1], [2], [0, 0, 0, 1, 1, 2], [0], [0]>} : vector<12x8x32xbf16>, vector<12x32x8xbf16>, vector<12x8x8xf32> -> vector<12x8x8xf32>
    %30 = vector.extract_strided_slice %29 {offsets = [0, 0, 0], sizes = [4, 8, 8], strides = [1, 1, 1]} : vector<12x8x8xf32> to vector<4x8x8xf32>
    %31 = arith.truncf %30 : vector<4x8x8xf32> to vector<4x8x8xbf16>
    %32 = vector.extract_strided_slice %29 {offsets = [4, 0, 0], sizes = [4, 8, 8], strides = [1, 1, 1]} : vector<12x8x8xf32> to vector<4x8x8xf32>
    %33 = arith.truncf %32 : vector<4x8x8xf32> to vector<4x8x8xbf16>
    %34 = vector.extract_strided_slice %29 {offsets = [8, 0, 0], sizes = [4, 8, 8], strides = [1, 1, 1]} : vector<12x8x8xf32> to vector<4x8x8xf32>
    %35 = arith.truncf %34 : vector<4x8x8xf32> to vector<4x8x8xbf16>
    %cst_13 = arith.constant dense<0.000000e+00> : vector<4x8x8xf32>
    %36 = tpu.matmul %31, %33, %cst_13 {dimension_numbers = #tpu.dot_dimension_numbers<[2], [2], [1], [1], [0, 0, 0, 1, 1, 1], [0], [0]>} : vector<4x8x8xbf16>, vector<4x8x8xbf16>, vector<4x8x8xf32> -> vector<4x8x8xf32>
    %cst_14 = arith.constant 0.353553385 : f32
    %37 = vector.broadcast %cst_14 : f32 to vector<4x8x8xf32>
    %38 = arith.mulf %36, %37 : vector<4x8x8xf32>
    %39 = tpu.iota {dimensions = array<i32: 0>} : vector<8x8xi32>
    %40 = tpu.iota {dimensions = array<i32: 1>} : vector<8x8xi32>
    %41 = arith.cmpi sge, %39, %40 : vector<8x8xi32>
    %cst_15 = arith.constant -1.000000e+30 : f32
    %42 = vector.shape_cast %41 : vector<8x8xi1> to vector<1x8x8xi1>
    %43 = vector.broadcast %42 : vector<1x8x8xi1> to vector<4x8x8xi1>
    %44 = vector.broadcast %cst_15 : f32 to vector<4x8x8xf32>
    %45 = arith.select %43, %38, %44 : vector<4x8x8xi1>, vector<4x8x8xf32>
    %cst_16 = arith.constant dense<0xFF800000> : vector<4x8xf32>
    %46 = vector.multi_reduction <maximumf>, %45, %cst_16 [2] : vector<4x8x8xf32> to vector<4x8xf32>
    %47 = vector.shape_cast %46 : vector<4x8xf32> to vector<4x8x1xf32>
    %48 = vector.broadcast %47 : vector<4x8x1xf32> to vector<4x8x8xf32>
    %49 = arith.subf %45, %48 : vector<4x8x8xf32>
    %50 = math.exp %49 : vector<4x8x8xf32>
    %cst_17 = arith.constant dense<0.000000e+00> : vector<4x8xf32>
    %51 = vector.multi_reduction <add>, %50, %cst_17 [2] : vector<4x8x8xf32> to vector<4x8xf32>
    %52 = vector.shape_cast %51 : vector<4x8xf32> to vector<4x8x1xf32>
    %53 = tpu.reciprocal %52 : vector<4x8x1xf32> -> vector<4x8x1xf32>
    %54 = vector.broadcast %53 : vector<4x8x1xf32> to vector<4x8x8xf32>
    %55 = arith.mulf %50, %54 : vector<4x8x8xf32>
    %56 = arith.truncf %55 : vector<4x8x8xf32> to vector<4x8x8xbf16>
    %cst_18 = arith.constant dense<0.000000e+00> : vector<4x8x8xf32>
    %57 = tpu.matmul %56, %35, %cst_18 {dimension_numbers = #tpu.dot_dimension_numbers<[2], [1], [1], [2], [0, 0, 0, 1, 1, 2], [0], [0]>} : vector<4x8x8xbf16>, vector<4x8x8xbf16>, vector<4x8x8xf32> -> vector<4x8x8xf32>
    %58 = vector.extract_strided_slice %57 {offsets = [0, 0, 0], sizes = [1, 8, 8], strides = [1, 1, 1]} : vector<4x8x8xf32> to vector<1x8x8xf32>
    %59 = vector.shape_cast %58 : vector<1x8x8xf32> to vector<8x8xf32>
    %60 = vector.extract_strided_slice %57 {offsets = [1, 0, 0], sizes = [1, 8, 8], strides = [1, 1, 1]} : vector<4x8x8xf32> to vector<1x8x8xf32>
    %61 = vector.shape_cast %60 : vector<1x8x8xf32> to vector<8x8xf32>
    %62 = vector.extract_strided_slice %57 {offsets = [2, 0, 0], sizes = [1, 8, 8], strides = [1, 1, 1]} : vector<4x8x8xf32> to vector<1x8x8xf32>
    %63 = vector.shape_cast %62 : vector<1x8x8xf32> to vector<8x8xf32>
    %64 = vector.extract_strided_slice %57 {offsets = [3, 0, 0], sizes = [1, 8, 8], strides = [1, 1, 1]} : vector<4x8x8xf32> to vector<1x8x8xf32>
    %65 = vector.shape_cast %64 : vector<1x8x8xf32> to vector<8x8xf32>
    %66 = tpu.concatenate %59, %61, %63, %65 in 1 : vector<8x8xf32>, vector<8x8xf32>, vector<8x8xf32>, vector<8x8xf32> -> vector<8x32xf32>
    %67 = arith.truncf %66 : vector<8x32xf32> to vector<8x32xbf16>
    %c0_19 = arith.constant 0 : index
    %c0_20 = arith.constant 0 : index
    %68 = vector.load %arg5[%c0_19, %c0_20] : memref<32x32xbf16, #tpu.memory_space<vmem>>, vector<32x32xbf16>
    %cst_21 = arith.constant dense<0.000000e+00> : vector<8x32xf32>
    %69 = tpu.matmul %67, %68, %cst_21 {dimension_numbers = #tpu.dot_dimension_numbers<[1], [0], [0], [1], [0, 0, 1, 1], [], []>} : vector<8x32xbf16>, vector<32x32xbf16>, vector<8x32xf32> -> vector<8x32xf32>
    %c0_22 = arith.constant 0 : index
    %c0_23 = arith.constant 0 : index
    %70 = vector.load %arg6[%c0_22, %c0_23] : memref<1x32xf32, #tpu.memory_space<vmem>>, vector<1x32xf32>
    %71 = vector.broadcast %70 : vector<1x32xf32> to vector<8x32xf32>
    %72 = arith.addf %69, %71 : vector<8x32xf32>
    %73 = arith.addf %0, %72 : vector<8x32xf32>
    %c0_24 = arith.constant 0 : index
    %c0_25 = arith.constant 0 : index
    %74 = vector.load %arg7[%c0_24, %c0_25] : memref<1x32xf32, #tpu.memory_space<vmem>>, vector<1x32xf32>
    %c0_26 = arith.constant 0 : index
    %c0_27 = arith.constant 0 : index
    %75 = vector.load %arg8[%c0_26, %c0_27] : memref<1x32xf32, #tpu.memory_space<vmem>>, vector<1x32xf32>
    %cst_28 = arith.constant dense<0.000000e+00> : vector<8xf32>
    %76 = vector.multi_reduction <add>, %73, %cst_28 [1] : vector<8x32xf32> to vector<8xf32>
    %77 = vector.shape_cast %76 : vector<8xf32> to vector<8x1xf32>
    %cst_29 = arith.constant 3.200000e+01 : f32
    %78 = vector.broadcast %cst_29 : f32 to vector<8x1xf32>
    %79 = arith.divf %77, %78 : vector<8x1xf32>
    %80 = vector.broadcast %79 : vector<8x1xf32> to vector<8x32xf32>
    %81 = arith.subf %73, %80 : vector<8x32xf32>
    %82 = arith.mulf %81, %81 : vector<8x32xf32>
    %cst_30 = arith.constant dense<0.000000e+00> : vector<8xf32>
    %83 = vector.multi_reduction <add>, %82, %cst_30 [1] : vector<8x32xf32> to vector<8xf32>
    %84 = vector.shape_cast %83 : vector<8xf32> to vector<8x1xf32>
    %cst_31 = arith.constant 3.200000e+01 : f32
    %85 = vector.broadcast %cst_31 : f32 to vector<8x1xf32>
    %86 = arith.divf %84, %85 : vector<8x1xf32>
    %87 = vector.broadcast %79 : vector<8x1xf32> to vector<8x32xf32>
    %88 = arith.subf %73, %87 : vector<8x32xf32>
    %cst_32 = arith.constant 9.99999974E-6 : f32
    %89 = vector.broadcast %cst_32 : f32 to vector<8x1xf32>
    %90 = arith.addf %86, %89 : vector<8x1xf32>
    %91 = math.rsqrt %90 : vector<8x1xf32>
    %92 = vector.broadcast %91 : vector<8x1xf32> to vector<8x32xf32>
    %93 = arith.mulf %88, %92 : vector<8x32xf32>
    %94 = vector.broadcast %74 : vector<1x32xf32> to vector<8x32xf32>
    %95 = arith.mulf %93, %94 : vector<8x32xf32>
    %96 = vector.broadcast %75 : vector<1x32xf32> to vector<8x32xf32>
    %97 = arith.addf %95, %96 : vector<8x32xf32>
    %98 = arith.truncf %97 : vector<8x32xf32> to vector<8x32xbf16>
    %c0_33 = arith.constant 0 : index
    %c0_34 = arith.constant 0 : index
    %99 = vector.load %arg9[%c0_33, %c0_34] : memref<32x128xbf16, #tpu.memory_space<vmem>>, vector<32x128xbf16>
    %cst_35 = arith.constant dense<0.000000e+00> : vector<8x128xf32>
    %100 = tpu.matmul %98, %99, %cst_35 {dimension_numbers = #tpu.dot_dimension_numbers<[1], [0], [0], [1], [0, 0, 1, 1], [], []>} : vector<8x32xbf16>, vector<32x128xbf16>, vector<8x128xf32> -> vector<8x128xf32>
    %c0_36 = arith.constant 0 : index
    %c0_37 = arith.constant 0 : index
    %101 = vector.load %arg10[%c0_36, %c0_37] : memref<1x128xf32, #tpu.memory_space<vmem>>, vector<1x128xf32>
    %102 = vector.broadcast %101 : vector<1x128xf32> to vector<8x128xf32>
    %103 = arith.addf %100, %102 : vector<8x128xf32>
    %cst_38 = arith.constant 0.000000e+00 : f32
    %104 = vector.broadcast %cst_38 : f32 to vector<8x128xf32>
    %105 = arith.maximumf %103, %104 : vector<8x128xf32>
    %106 = arith.truncf %105 : vector<8x128xf32> to vector<8x128xbf16>
    %c0_39 = arith.constant 0 : index
    %c0_40 = arith.constant 0 : index
    %107 = vector.load %arg11[%c0_39, %c0_40] : memref<128x32xbf16, #tpu.memory_space<vmem>>, vector<128x32xbf16>
    %cst_41 = arith.constant dense<0.000000e+00> : vector<8x32xf32>
    %108 = tpu.matmul %106, %107, %cst_41 {dimension_numbers = #tpu.dot_dimension_numbers<[1], [0], [0], [1], [0, 0, 1, 1], [], []>} : vector<8x128xbf16>, vector<128x32xbf16>, vector<8x32xf32> -> vector<8x32xf32>
    %c0_42 = arith.constant 0 : index
    %c0_43 = arith.constant 0 : index
    %109 = vector.load %arg12[%c0_42, %c0_43] : memref<1x32xf32, #tpu.memory_space<vmem>>, vector<1x32xf32>
    %110 = vector.broadcast %109 : vector<1x32xf32> to vector<8x32xf32>
    %111 = arith.addf %108, %110 : vector<8x32xf32>
    %112 = arith.addf %73, %111 : vector<8x32xf32>
    %c0_44 = arith.constant 0 : index
    %c0_45 = arith.constant 0 : index
    %113 = vector.load %arg13[%c0_44, %c0_45] : memref<8x32xf32, #tpu.memory_space<vmem>>, vector<8x32xf32>
    tpu.vector_store %arg13[%c0_44, %c0_45], %112 {strides = array<i32>} : memref<8x32xf32, #tpu.memory_space<vmem>>, vector<8x32xf32>,
    return
  }
  func.func @transform_0(%arg0: i32) -> (i32, i32) {
    %c0_i32 = arith.constant 0 : i32
    %c0_i32_0 = arith.constant 0 : i32
    return %arg0, %c0_i32 : i32, i32
  }
  func.func @transform_1(%arg0: i32) -> (i32, i32) {
    %c0_i32 = arith.constant 0 : i32
    %c0_i32_0 = arith.constant 0 : i32
    %c0_i32_1 = arith.constant 0 : i32
    return %c0_i32, %c0_i32_0 : i32, i32
  }
  func.func @transform_2(%arg0: i32) -> (i32, i32) {
    %c0_i32 = arith.constant 0 : i32
    %c0_i32_0 = arith.constant 0 : i32
    %c0_i32_1 = arith.constant 0 : i32
    return %c0_i32, %c0_i32_0 : i32, i32
  }
  func.func @transform_3(%arg0: i32) -> (i32, i32, i32) {
    %c0_i32 = arith.constant 0 : i32
    %c0_i32_0 = arith.constant 0 : i32
    %c0_i32_1 = arith.constant 0 : i32
    %c0_i32_2 = arith.constant 0 : i32
    return %c0_i32, %c0_i32_0, %c0_i32_1 : i32, i32, i32
  }
  func.func @transform_4(%arg0: i32) -> (i32, i32) {
    %c0_i32 = arith.constant 0 : i32
    %c0_i32_0 = arith.constant 0 : i32
    %c0_i32_1 = arith.constant 0 : i32
    return %c0_i32, %c0_i32_0 : i32, i32
  }
  func.func @transform_5(%arg0: i32) -> (i32, i32) {
    %c0_i32 = arith.constant 0 : i32
    %c0_i32_0 = arith.constant 0 : i32
    %c0_i32_1 = arith.constant 0 : i32
    return %c0_i32, %c0_i32_0 : i32, i32
  }
  func.func @transform_6(%arg0: i32) -> (i32, i32) {
    %c0_i32 = arith.constant 0 : i32
    %c0_i32_0 = arith.constant 0 : i32
    %c0_i32_1 = arith.constant 0 : i32
    return %c0_i32, %c0_i32_0 : i32, i32
  }
  func.func @transform_7(%arg0: i32) -> (i32, i32) {
    %c0_i32 = arith.constant 0 : i32
    %c0_i32_0 = arith.constant 0 : i32
    %c0_i32_1 = arith.constant 0 : i32
    return %c0_i32, %c0_i32_0 : i32, i32
  }
  func.func @transform_8(%arg0: i32) -> (i32, i32) {
    %c0_i32 = arith.constant 0 : i32
    %c0_i32_0 = arith.constant 0 : i32
    %c0_i32_1 = arith.constant 0 : i32
    return %c0_i32, %c0_i32_0 : i32, i32
  }
  func.func @transform_9(%arg0: i32) -> (i32, i32) {
    %c0_i32 = arith.constant 0 : i32
    %c0_i32_0 = arith.constant 0 : i32
    %c0_i32_1 = arith.constant 0 : i32
    return %c0_i32, %c0_i32_0 : i32, i32
  }
  func.func @transform_10(%arg0: i32) -> (i32, i32) {
    %c0_i32 = arith.constant 0 : i32
    %c0_i32_0 = arith.constant 0 : i32
    %c0_i32_1 = arith.constant 0 : i32
    return %c0_i32, %c0_i32_0 : i32, i32
  }
  func.func @transform_11(%arg0: i32) -> (i32, i32) {
    %c0_i32 = arith.constant 0 : i32
    %c0_i32_0 = arith.constant 0 : i32
    %c0_i32_1 = arith.constant 0 : i32
    return %c0_i32, %c0_i32_0 : i32, i32
  }
  func.func @transform_12(%arg0: i32) -> (i32, i32) {
    %c0_i32 = arith.constant 0 : i32
    %c0_i32_0 = arith.constant 0 : i32
    return %arg0, %c0_i32 : i32, i32
  }
}

</mosaic_0001>

<bundles_post_ra>
// kernel: block_forward.1
= control target key start
LH: loop header
LB: loop body
LE: loop exit
PB: predicated region body
PF: predicated region fallthrough
CT: control target
= control target key end

     0   :  { %s2883_s0 = inlined_call_operand.vmem [shape: f32[16,32], index: 0, kind: input, shape index: {}]   ;;  %s2884_s1 = inlined_call_operand.vmem [shape: f32[1,32], index: 1, kind: input, shape index: {}]   ;;  %s2885_s2 = inlined_call_operand.vmem [shape: f32[1,32], index: 2, kind: input, shape index: {}]   ;;  %s2886_s3 = inlined_call_operand.vmem [shape: bf16[12,32,8], index: 3, kind: input, shape index: {}]   ;;  %s2887_s4 = inlined_call_operand.vmem [shape: bf16[32,32], index: 4, kind: input, shape index: {}]   ;;  %s2888_s5 = inlined_call_operand.vmem [shape: f32[1,32], index: 5, kind: input, shape index: {}]   ;;  %s2889_s6 = inlined_call_operand.vmem [shape: f32[1,32], index: 6, kind: input, shape index: {}]   ;;  %s2890_s7 = inlined_call_operand.vmem [shape: f32[1,32], index: 7, kind: input, shape index: {}]   ;;  %s2891_s8 = inlined_call_operand.vmem [shape: bf16[32,128], index: 8, kind: input, shape index: {}]   ;;  %s2892_s9 = inlined_call_operand.vmem [shape: f32[1,128], index: 9, kind: input, shape index: {}]   ;;  %s2893_s10 = inlined_call_operand.vmem [shape: bf16[128,32], index: 10, kind: input, shape index: {}]   ;;  %s2894_s11 = inlined_call_operand.vmem [shape: f32[1,32], index: 11, kind: input, shape index: {}]   ;;  %s2895_s12 = inlined_call_operand.hbm [shape: f32[16,32], index: 12, kind: output, shape index: {}]  }
   0x1   :  { %2896 = sst [smem:[#allocation5_spill]] %s2883_s0 }
   0x2   :  { %2897 = sst [smem:[#allocation6_spill]] %s2884_s1 }
   0x3   :  { %17 = vsyncpa [#allocation3], 0 }
   0x4   :  { %19 = vsyncpa [#allocation3 + $0x1], 0  ;;  %s2487_s21 = smov 0   ;;  %s2489_s22 = smov 0  }
   0x5   :  { %s2491_s23 = smov 0   ;;  %s2493_s24 = smov 0  }
   0x6 LB: > { %s2508_s25 = sadd.s32 4294967295, %s2414_s24   ;;  %s1932_s26 = sadd.s32 4294967294, %s2414_s24   ;;  %s2414_s24 = sphi %s2493_s24, %s2905_s24   ;;  %s2410_s23 = sphi %s2491_s23, %s2904_s23   ;;  %s2406_s22 = sphi %s2489_s22, %s2903_s22   ;;  %s2402_s21 = sphi %s2487_s21, %s2902_s21  }
   0x7   : > { %s2512_s27 = sadd.s32 1, %s2414_s24   ;;  %s289_s28 = sadd.s32 1, %s2410_s23 }
   0x8   : > { %s286_s29 = ssub.s32 %s2414_s24, %s2512_s27  ;;  %p299_p0 = scmp.ne.s32.totalorder %s2410_s23, %s2406_s22 }
   0x9   : > { %p287_p1 = scmp.eq.s32.totalorder %s286_s29, 0  ;;  %p300_p2 = scmp.eq.s32.totalorder %s2508_s25, 1 }
   0xa   : > { %p305_p3 = scmp.ne.s32.totalorder %s2406_s22, %s2402_s21  ;;  %p306_p4 = scmp.eq.s32.totalorder %s1932_s26, 1 }
   0xb   : > { %s2523_s30 = scalar_select %p287_p1, %s2410_s23, %s289_s28  }
   0xc   : > { %p2525_p5 = por %p300_p2, %p299_p0  ;;  %p2529_p6 = por %p306_p4, %p305_p3 }
   0xd   : > { %p1935_p7 = scmp.ge.s32.totalorder %s2414_s24, 1  ;;  %p364_p8 = scmp.lt.s32.totalorder %s2414_s24, 3 }
   0xf   : > { %p365_p9 = pnand %p1935_p7, %p364_p8 }
  0x10   : > { %p405_p10 = scmp.lt.s32.totalorder (!%p365_p9), %s2508_s25, 1  ;;  %s2900_s0 = sld [smem:[#allocation5_spill]] (!%p365_p9) }
  0x11   : > { %368 = sbr.rel (%p365_p9) target bundleno = 2318 (0x90e), region = 68  ;;  %s2901_s1 = sld [smem:[#allocation6_spill]] (!%p365_p9) }
  0x12   : > { %s2418_s18 = smov (!%p365_p9), 16   ;;  %s2419_s29 = smov (!%p365_p9), 8  }
  0x13   : > { %s402_s17 = sand.u32 (!%p365_p9), 1, %s2406_s22   ;;  %s2004_s26 = sshll.u32 (!%p365_p9), %s2508_s25, 7 }
  0x16   : > { %s406_s15 = scalar_select %p405_p10, %s2508_s25, 1  ;;  %vm413_vm0 = vcmask 261120   ;;  %v2298_v7 = vld [vmem:[%s2886_s3 + $0x8] sm:$0xff]   ;;  %v2416_v9 = vmov 0.0   ;;  %v2300_v10 = vld [vmem:[%s2886_s3] sm:$0xff]   ;;  %vm2417_vm1 = vmmov 0  }
  0x17   : > { %v2299_v8 = vld [vmem:[%s2886_s3 + $0x48] sm:$0xff]   ;;  %2074 = vmatprep.subr.bf16.mxu1 %v2416_v9  ;;  %2106 = vmatprep.subr.bf16.mxu0 %v2416_v9  ;;  %v2301_v11 = vld [vmem:[%s2886_s3 + $0x40] sm:$0xff]   ;;  %v2302_v21 = vld [vmem:[%s2886_s3 + $0x18] sm:$0xff]   ;;  %vm1130_vm2 = vcmask 64512   ;;  %vm1381_vm3 = vcmask 1043456   ;;  %vm1576_vm5 = vcmask 130048  }
  0x18   : > { %s1937_s16 = sshll.u32 %s406_s15, 3  ;;  %2075 = vmatpush3.bf16.msra.mxu1 %v2298_v7  ;;  %2107 = vmatpush3.bf16.msra.mxu0 %v2299_v8  ;;  %v1938_v16 = vld [vmem:[%s2901_s1] ss:$0 sm:$0xff]  ;;  %v2303_v22 = vld [vmem:[%s2886_s3 + $0x68] sm:$0xff]   ;;  %v2304_v24 = vld [vmem:[%s2886_s3 + $0x10] sm:$0xff]   ;;  %s2420_s15 = smov 24  }
  0x19   : > { %s408_s19 = scalar_lea.vmem %s2900_s0, %s1937_s16  ;;  %2076 = vmatprep.subr.bf16.mxu1 %v2416_v9  ;;  %2108 = vmatprep.subr.bf16.mxu0 %v2416_v9  ;;  %v1939_v18 = vld [vmem:[%s2885_s2] ss:$0 sm:$0xff]  ;;  %v2306_v26 = vld [vmem:[%s2886_s3 + $0x28] sm:$0xff]   ;;  %v2310_v30 = vld [vmem:[%s2886_s3 + $0x38] sm:$0xff]   ;;  %vm1578_vm6 = vcmask 195584   ;;  %s2841_s0 = scalar_lea.hbm %s2895_s12, %s2004_s26 }
  0x1a   : > { %v2540_v0 = vld [vmem:[%s408_s19] sm:$0xff]  ;;  %2078 = vmatprep.mubr.msk.bf16.mxu1 %vm2417_vm1, %v2416_v9  ;;  %2110 = vmatprep.mubr.msk.bf16.mxu0 %vm2417_vm1, %v2416_v9  ;;  %v2307_v27 = vld [vmem:[%s2886_s3 + $0x88] sm:$0xff]   ;;  %v2312_v32 = vld [vmem:[%s2886_s3 + $0x30] sm:$0xff]   ;;  %s1860_s25 = scalar_lea.sflag [#allocation3], %s402_s17  ;;  %s2421_s19 = smov [#allocation2]  }
  0x1b   : > { %v414_v1 = vsel %vm413_vm0, %v2540_v0, 0.0  ;;  %v2305_v25 = vld [vmem:[%s2886_s3 + $0x60] sm:$0xff]   ;;  %v2311_v31 = vld [vmem:[%s2886_s3 + $0xa8] sm:$0xff]   ;;  %v2314_v34 = vld [vmem:[%s2886_s3 + $0x58] sm:$0xff]   ;;  %s2358_s20 = sshll.u32 %s2421_s19, 4  ;;  %s2359_s20 = int_to_ptr.vmem [resolvable:$false] %s2358_s20 }
  0x1c   : > { %415 = vadd.xlane.f32.xlu0 %v414_v1  ;;  %2077 = vmatpush3.bf16.msra.mxu1 %v2300_v10  ;;  %v2308_v28 = vld [vmem:[%s2886_s3 + $0x20] sm:$0xff]   ;;  %v2315_v35 = vld [vmem:[%s2886_s3 + $0x50] sm:$0xff]   ;;  %v2316_v36 = vld [vmem:[%s2886_s3 + $0x78] sm:$0xff]   ;;  %s2360_s26 = scalar_lea.vmem %s2359_s20, 256 }
  0x1d   : > { %2109 = vmatpush3.bf16.msra.mxu0 %v2301_v11  ;;  %2082 = vmatprep.subr.bf16.mxu1 %v2416_v9  ;;  %v2309_v29 = vld [vmem:[%s2886_s3 + $0x80] sm:$0xff]   ;;  %v2317_v37 = vld [vmem:[%s2886_s3 + $0x70] sm:$0xff]   ;;  %v2318_v38 = vld [vmem:[%s2886_s3 + $0x98] sm:$0xff]  }
  0x1e   : > { %2122 = vmatprep.subr.bf16.mxu0 %v2416_v9  ;;  %v2313_v33 = vld [vmem:[%s2886_s3 + $0xa0] sm:$0xff]   ;;  %v2319_v39 = vld [vmem:[%s2886_s3 + $0x90] sm:$0xff]   ;;  %v2320_v40 = vld [vmem:[%s2886_s3 + $0xb8] sm:$0xff]  }
  0x1f   : > { %v2321_v41 = vld [vmem:[%s2886_s3 + $0xb0] sm:$0xff]  }
  0xa5   : > { %v416_v2 = vpop.xlane.xlu0 %415 }
  0xa6   : > { %v418_v3 = vmul.f32 0.03125, %v416_v2 }
  0xa8   : > { %v419_v4 = vsub.f32 %v2540_v0, %v418_v3 }
  0xaa   : > { %v420_v5 = vmul.f32 %v419_v4, %v419_v4 }
  0xac   : > { %v421_v6 = vsel %vm413_vm0, %v420_v5, 0.0 }
  0xad   : > { %422 = vadd.xlane.f32.xlu0 %v421_v6 }
 0x136   : > { %v423_v12 = vpop.xlane.xlu0 %422 }
 0x137   : > { %v424_v13 = vmul.f32 0.03125, %v423_v12 }
 0x139   : > { %v425_v14 = vadd.f32 1e-05, %v424_v13 }
 0x13b   : > { %2334 = vrsqrt.f32 %v425_v14 }
 0x148   : > { %v2335_v15 = vpop.eup %2334 }
 0x149   : > { %v427_v17 = vmul.f32 %v2335_v15, %v419_v4 }
 0x14b   : > { %v434_v19 = vmul.f32 %v1938_v16, %v427_v17 }
 0x14d   : > { %v441_v20 = vadd.f32 %v1939_v18, %v434_v19 }
 0x14f   : > { %v2580_v23 = vpack.c.bf16 %v441_v20, %v441_v20 }
 0x151   : > { %2079 = vmatmul.mubr.msk.bf16.vlgmr.msra.gmra.mxu1 %vm413_vm0, %v2580_v23  ;;  %2111 = vmatmul.mubr.msk.bf16.vlgmr.msra.gmra.mxu0 %vm413_vm0, %v2580_v23 }
 0x152   : > { %2083 = vmatpush3.bf16.msra.mxu1 %v2302_v21  ;;  %2123 = vmatpush3.bf16.msra.mxu0 %v2303_v22 }
 0x153   : > { %2084 = vmatprep.subr.bf16.mxu1 %v2416_v9  ;;  %2124 = vmatprep.subr.bf16.mxu0 %v2416_v9 }
 0x154   : > { %2086 = vmatprep.mubr.msk.bf16.mxu1 %vm2417_vm1, %v2416_v9  ;;  %2126 = vmatprep.mubr.msk.bf16.mxu0 %vm2417_vm1, %v2416_v9 }
 0x156   : > { %2085 = vmatpush3.bf16.msra.mxu1 %v2304_v24  ;;  %2125 = vmatpush3.bf16.msra.mxu0 %v2305_v25 }
 0x157   : > { %2090 = vmatprep.subr.bf16.mxu1 %v2416_v9  ;;  %2138 = vmatprep.subr.bf16.mxu0 %v2416_v9 }
 0x159   : > { %2087 = vmatmul.mubr.msk.bf16.vlgmr.msra.gmra.mxu1 %vm413_vm0, %v2580_v23  ;;  %2127 = vmatmul.mubr.msk.bf16.vlgmr.msra.gmra.mxu0 %vm413_vm0, %v2580_v23 }
 0x15a   : > { %2091 = vmatpush3.bf16.msra.mxu1 %v2306_v26  ;;  %2139 = vmatpush3.bf16.msra.mxu0 %v2307_v27 }
 0x15b   : > { %2092 = vmatprep.subr.bf16.mxu1 %v2416_v9  ;;  %2140 = vmatprep.subr.bf16.mxu0 %v2416_v9 }
 0x15c   : > { %2094 = vmatprep.mubr.msk.bf16.mxu1 %vm2417_vm1, %v2416_v9  ;;  %2142 = vmatprep.mubr.msk.bf16.mxu0 %vm2417_vm1, %v2416_v9 }
 0x15e   : > { %2093 = vmatpush3.bf16.msra.mxu1 %v2308_v28  ;;  %2141 = vmatpush3.bf16.msra.mxu0 %v2309_v29 }
 0x15f   : > { %2098 = vmatprep.subr.bf16.mxu1 %v2416_v9  ;;  %2154 = vmatprep.subr.bf16.mxu0 %v2416_v9 }
 0x161   : > { %2095 = vmatmul.mubr.msk.bf16.vlgmr.msra.gmra.mxu1 %vm413_vm0, %v2580_v23  ;;  %2143 = vmatmul.mubr.msk.bf16.vlgmr.msra.gmra.mxu0 %vm413_vm0, %v2580_v23 }
 0x162   : > { %2099 = vmatpush3.bf16.msra.mxu1 %v2310_v30  ;;  %2155 = vmatpush3.bf16.msra.mxu0 %v2311_v31 }
 0x163   : > { %2100 = vmatprep.subr.bf16.mxu1 %v2416_v9  ;;  %2156 = vmatprep.subr.bf16.mxu0 %v2416_v9 }
 0x164   : > { %2102 = vmatprep.mubr.msk.bf16.mxu1 %vm2417_vm1, %v2416_v9  ;;  %2158 = vmatprep.mubr.msk.bf16.mxu0 %vm2417_vm1, %v2416_v9 }
 0x166   : > { %2101 = vmatpush3.bf16.msra.mxu1 %v2312_v32  ;;  %2157 = vmatpush3.bf16.msra.mxu0 %v2313_v33 }
 0x167   : > { %2114 = vmatprep.subr.bf16.mxu1 %v2416_v9  ;;  %2170 = vmatprep.subr.bf16.mxu0 %v2416_v9 }
 0x169   : > { %2103 = vmatmul.mubr.msk.bf16.vlgmr.msra.gmra.mxu1 %vm413_vm0, %v2580_v23  ;;  %2159 = vmatmul.mubr.msk.bf16.vlgmr.msra.gmra.mxu0 %vm413_vm0, %v2580_v23 }
 0x16a   : > { %2115 = vmatpush3.bf16.msra.mxu1 %v2314_v34  ;;  %2118 = vmatprep.mubr.msk.bf16.mxu1 %vm2417_vm1, %v2416_v9 }
 0x16b   : > { %2116 = vmatprep.subr.bf16.mxu1 %v2416_v9  ;;  %2172 = vmatprep.mubr.msk.bf16.mxu0 %vm2417_vm1, %v2416_v9 }
 0x16e   : > { %2117 = vmatpush3.bf16.msra.mxu1 %v2315_v35 }
 0x16f   : > { %2130 = vmatprep.subr.bf16.mxu1 %v2416_v9 }
 0x171   : > { %2119 = vmatmul.mubr.msk.bf16.vlgmr.msra.gmra.mxu1 %vm413_vm0, %v2580_v23 }
 0x172   : > { %2131 = vmatpush3.bf16.msra.mxu1 %v2316_v36  ;;  %2134 = vmatprep.mubr.msk.bf16.mxu1 %vm2417_vm1, %v2416_v9 }
 0x173   : > { %2132 = vmatprep.subr.bf16.mxu1 %v2416_v9 }
 0x176   : > { %2133 = vmatpush3.bf16.msra.mxu1 %v2317_v37 }
 0x177   : > { %2146 = vmatprep.subr.bf16.mxu1 %v2416_v9 }
 0x179   : > { %2135 = vmatmul.mubr.msk.bf16.vlgmr.msra.gmra.mxu1 %vm413_vm0, %v2580_v23 }
 0x17a   : > { %2147 = vmatpush3.bf16.msra.mxu1 %v2318_v38  ;;  %2150 = vmatprep.mubr.msk.bf16.mxu1 %vm2417_vm1, %v2416_v9 }
 0x17b   : > { %2148 = vmatprep.subr.bf16.mxu1 %v2416_v9 }
 0x17e   : > { %2149 = vmatpush3.bf16.msra.mxu1 %v2319_v39 }
 0x17f   : > { %2162 = vmatprep.subr.bf16.mxu1 %v2416_v9 }
 0x181   : > { %2151 = vmatmul.mubr.msk.bf16.vlgmr.msra.gmra.mxu1 %vm413_vm0, %v2580_v23 }
 0x182   : > { %2163 = vmatpush3.bf16.msra.mxu1 %v2320_v40  ;;  %2166 = vmatprep.mubr.msk.bf16.mxu1 %vm2417_vm1, %v2416_v9 }
 0x183   : > { %2164 = vmatprep.subr.bf16.mxu1 %v2416_v9 }
 0x186   : > { %2165 = vmatpush3.bf16.msra.mxu1 %v2321_v41 }
 0x187   : > { %2176 = vmatprep.subr.bf16.mxu1 %v2416_v9 }
 0x189   : > { %2167 = vmatmul.mubr.msk.bf16.vlgmr.msra.gmra.mxu1 %vm413_vm0, %v2580_v23 }
 0x18a   : > { %2178 = vmatprep.mubr.msk.bf16.mxu1 %vm2417_vm1, %v2416_v9 }
 0x211   : > { %v540_v42 = vpop.f32.mrf.mxu1  ;;  %v748_v43 = vpop.f32.mrf.mxu0 }
 0x212   : > { %v1122_v44 = vpack.c.bf16 %v748_v43, %v748_v43  ;;  %v1118_v54 = vpack.c.bf16 %v540_v42, %v540_v42 }
 0x213   : > { %v2080_v45 = vpop.f32.mrf.mxu1  ;;  %v2112_v46 = vpop.f32.mrf.mxu0 }
 0x214   : > { %v1135_v47 = vsel %vm1130_vm2, %v1122_v44, 0 }
 0x215   : > { %v543_v48 = vpop.f32.mrf.mxu1  ;;  %v751_v49 = vpop.f32.mrf.mxu0  ;;  %2171 = vmatpush3.bf16.xpose.msra.mxu0 %v1135_v47 }
 0x216   : > { %2182 = vmatprep.subr.bf16.mxu0 %v2416_v9  ;;  %v1319_v48 = vlaneseq }
 0x217   : > { %v2081_v50 = vpop.f32.mrf.mxu1  ;;  %v2113_v51 = vpop.f32.mrf.mxu0 }
 0x218   : > { %v1320_v49 = vshrl.u32 %v1319_v48, 7  ;;  %v1322_v50 = vand.u32 127, %v1319_v48 }
 0x219   : > { %v592_v52 = vpop.f32.mrf.mxu1  ;;  %v852_v53 = vpop.f32.mrf.mxu0 }
 0x21a   : > { %v1124_v55 = vpack.c.bf16 %v852_v53, %v852_v53  ;;  %v1119_v29 = vpack.c.bf16 %v592_v52, %v592_v52  ;;  %vm1323_vm4 = vcmp.ge.s32.totalorder %v1320_v49, %v1322_v50 }
 0x21b   : > { %v2088_v56 = vpop.f32.mrf.mxu1  ;;  %v2128_v57 = vpop.f32.mrf.mxu0 }
 0x21c   : > { %v1227_v58 = vsel %vm1130_vm2, %v1124_v55, 0  ;;  %2173 = vmatmul.mubr.msk.bf16.vlgmr.msra.gmra.mxu0 %vm1130_vm2, %v1118_v54 }
 0x21d   : > { %v595_v59 = vpop.f32.mrf.mxu1  ;;  %v855_v60 = vpop.f32.mrf.mxu0  ;;  %2183 = vmatpush3.bf16.xpose.msra.mxu0 %v1227_v58  ;;  %2184 = vmatprep.mubr.msk.bf16.mxu0 %vm2417_vm1, %v2416_v9 }
 0x21e   : > { %2194 = vmatprep.subr.bf16.mxu0 %v2416_v9 }
 0x21f   : > { %v2089_v61 = vpop.f32.mrf.mxu1  ;;  %v2129_v62 = vpop.f32.mrf.mxu0 }
 0x221   : > { %v644_v63 = vpop.f32.mrf.mxu1  ;;  %v956_v1 = vpop.f32.mrf.mxu0 }
 0x222   : > { %v1120_v2 = vpack.c.bf16 %v644_v63, %v644_v63  ;;  %v1126_v3 = vpack.c.bf16 %v956_v1, %v956_v1 }
 0x223   : > { %v2096_v4 = vpop.f32.mrf.mxu1  ;;  %v2144_v5 = vpop.f32.mrf.mxu0 }
 0x224   : > { %v1383_v6 = vsel %vm1381_vm3, %v1126_v3, 0  ;;  %2185 = vmatmul.mubr.msk.bf16.vlgmr.msra.gmra.mxu0 %vm1130_vm2, %v1120_v2 }
 0x225   : > { %v647_v7 = vpop.f32.mrf.mxu1  ;;  %v959_v8 = vpop.f32.mrf.mxu0  ;;  %2195 = vmatpush3.bf16.msra.mxu0 %v1383_v6  ;;  %2196 = vmatprep.mubr.msk.bf16.mxu0 %vm2417_vm1, %v2416_v9 }
 0x226   : > { %2206 = vmatprep.subr.bf16.mxu0 %v2416_v9 }
 0x227   : > { %v2097_v10 = vpop.f32.mrf.mxu1  ;;  %v2145_v11 = vpop.f32.mrf.mxu0 }
 0x229   : > { %v696_v12 = vpop.f32.mrf.mxu1  ;;  %v1060_v13 = vpop.f32.mrf.mxu0 }
 0x22a   : > { %v1128_v14 = vpack.c.bf16 %v1060_v13, %v1060_v13  ;;  %v1121_v36 = vpack.c.bf16 %v696_v12, %v696_v12 }
 0x22b   : > { %v2104_v15 = vpop.f32.mrf.mxu1  ;;  %v2160_v16 = vpop.f32.mrf.mxu0 }
 0x22c   : > { %v2717_v17 = vsel %vm1381_vm3, %v1128_v14, 0 }
 0x22d   : > { %v699_v18 = vpop.f32.mrf.mxu1  ;;  %v1063_v19 = vpop.f32.mrf.mxu0 }
 0x22f   : > { %v2105_v20 = vpop.f32.mrf.mxu1  ;;  %v2161_v21 = vpop.f32.mrf.mxu0 }
 0x231   : > { %v800_v22 = vpop.f32.mrf.mxu1 }
 0x232   : > { %v1123_v23 = vpack.c.bf16 %v800_v22, %v800_v22 }
 0x233   : > { %v2120_v24 = vpop.f32.mrf.mxu1 }
 0x234   : > { %v1181_v25 = vsel %vm1130_vm2, %v1123_v23, 0 }
 0x235   : > { %v803_v26 = vpop.f32.mrf.mxu1  ;;  %2177 = vmatpush3.bf16.xpose.msra.mxu1 %v1181_v25 }
 0x236   : > { %2188 = vmatprep.subr.bf16.mxu1 %v2416_v9 }
 0x237   : > { %v2121_v27 = vpop.f32.mrf.mxu1 }
 0x239   : > { %v904_v28 = vpop.f32.mrf.mxu1 }
 0x23a   : > { %v1125_v30 = vpack.c.bf16 %v904_v28, %v904_v28 }
 0x23b   : > { %v2136_v31 = vpop.f32.mrf.mxu1 }
 0x23c   : > { %v1273_v32 = vsel %vm1130_vm2, %v1125_v30, 0  ;;  %2179 = vmatmul.mubr.msk.bf16.vlgmr.msra.gmra.mxu1 %vm1130_vm2, %v1119_v29 }
 0x23d   : > { %v907_v33 = vpop.f32.mrf.mxu1  ;;  %2189 = vmatpush3.bf16.xpose.msra.mxu1 %v1273_v32  ;;  %2190 = vmatprep.mubr.msk.bf16.mxu1 %vm2417_vm1, %v2416_v9 }
 0x23e   : > { %2200 = vmatprep.subr.bf16.mxu1 %v2416_v9 }
 0x23f   : > { %v2137_v34 = vpop.f32.mrf.mxu1 }
 0x241   : > { %v1008_v35 = vpop.f32.mrf.mxu1 }
 0x242   : > { %v1127_v37 = vpack.c.bf16 %v1008_v35, %v1008_v35 }
 0x243   : > { %v2152_v38 = vpop.f32.mrf.mxu1 }
 0x244   : > { %v1429_v39 = vsel %vm1381_vm3, %v1127_v37, 0  ;;  %2191 = vmatmul.mubr.msk.bf16.vlgmr.msra.gmra.mxu1 %vm1130_vm2, %v1121_v36 }
 0x245   : > { %v1011_v40 = vpop.f32.mrf.mxu1  ;;  %2201 = vmatpush3.bf16.msra.mxu1 %v1429_v39  ;;  %2202 = vmatprep.mubr.msk.bf16.mxu1 %vm2417_vm1, %v2416_v9 }
 0x246   : > { %2212 = vmatprep.subr.bf16.mxu1 %v2416_v9 }
 0x247   : > { %v2153_v41 = vpop.f32.mrf.mxu1 }
 0x249   : > { %v1112_v42 = vpop.f32.mrf.mxu1 }
 0x24a   : > { %v1129_v43 = vpack.c.bf16 %v1112_v42, %v1112_v42 }
 0x24b   : > { %v2168_v44 = vpop.f32.mrf.mxu1 }
 0x24c   : > { %v2732_v45 = vsel %vm1381_vm3, %v1129_v43, 0 }
 0x24d   : > { %v1115_v46 = vpop.f32.mrf.mxu1 }
 0x24f   : > { %v2169_v47 = vpop.f32.mrf.mxu1 }
 0x2dc   : > { %v1171_v51 = vpop.f32.mrf.mxu0 }
 0x2dd   : > { %v1315_v52 = vmul.f32 0.35355338, %v1171_v51 }
 0x2de   : > { %v2174_v53 = vpop.f32.mrf.mxu0 }
 0x2df   : > { %v1326_v54 = vsel %vm1323_vm4, %v1315_v52, -1e+30 }
 0x2e0   : > { %v1174_v55 = vpop.f32.mrf.mxu0  ;;  %v1330_v56 = vsel %vm1130_vm2, %v1326_v54, -inf }
 0x2e1   : > { %1331 = vmax.xlane.f32.xlu1 %v1330_v56 }
 0x2e2   : > { %v2175_v57 = vpop.f32.mrf.mxu0 }
 0x2e4   : > { %v1263_v58 = vpop.f32.mrf.mxu0 }
 0x2e5   : > { %v1317_v59 = vmul.f32 0.35355338, %v1263_v58 }
 0x2e6   : > { %v2186_v60 = vpop.f32.mrf.mxu0 }
 0x2e7   : > { %v1328_v61 = vsel %vm1323_vm4, %v1317_v59, -1e+30 }
 0x2e8   : > { %v1266_v62 = vpop.f32.mrf.mxu0  ;;  %v1336_v63 = vsel %vm1130_vm2, %v1328_v61, -inf }
 0x2e9   : > { %1337 = vmax.xlane.f32.xlu0 %v1336_v63  ;;  %v2323_v62 = vld [vmem:[%s2887_s4] sm:$0xff]  }
 0x2ea   : > { %v2187_v1 = vpop.f32.mrf.mxu0 }
 0x2fc   : > { %v1217_v2 = vpop.f32.mrf.mxu1 }
 0x2fd   : > { %v1316_v3 = vmul.f32 0.35355338, %v1217_v2 }
 0x2fe   : > { %v2180_v4 = vpop.f32.mrf.mxu1 }
 0x2ff   : > { %v1327_v5 = vsel %vm1323_vm4, %v1316_v3, -1e+30 }
 0x300   : > { %v1220_v6 = vpop.f32.mrf.mxu1  ;;  %v1333_v7 = vsel %vm1130_vm2, %v1327_v5, -inf }
 0x301   : > { %1334 = vmax.xlane.f32.xlu1 %v1333_v7 }
 0x302   : > { %v2181_v8 = vpop.f32.mrf.mxu1 }
 0x304   : > { %v1309_v10 = vpop.f32.mrf.mxu1 }
 0x305   : > { %v1318_v11 = vmul.f32 0.35355338, %v1309_v10 }
 0x306   : > { %v2192_v12 = vpop.f32.mrf.mxu1 }
 0x307   : > { %v1329_v13 = vsel %vm1323_vm4, %v1318_v11, -1e+30 }
 0x308   : > { %v1312_v14 = vpop.f32.mrf.mxu1  ;;  %v1339_v15 = vsel %vm1130_vm2, %v1329_v13, -inf }
 0x309   : > { %1340 = vmax.xlane.f32.xlu1 %v1339_v15 }
 0x30a   : > { %v2193_v16 = vpop.f32.mrf.mxu1 }
 0x30b   : > { %v1984_v16 = vld [vmem:[%s2888_s5] ss:$0 sm:$0xff] }
 0x36a   : > { %v1332_v18 = vpop.xlane.xlu1 %1331 }
 0x36b   : > { %v1342_v19 = vsub.f32 %v1326_v54, %v1332_v18 }
 0x36d   : > { %v1346_v20 = vmul.f32 1.442695, %v1342_v19 }
 0x36f   : > { %2336 = vpow2.f32 %v1346_v20 }
 0x372   : > { %v1338_v21 = vpop.xlane.xlu0 %1337 }
 0x373   : > { %v1344_v22 = vsub.f32 %v1328_v61, %v1338_v21  ;;  %v2322_v61 = vld [vmem:[%s2887_s4 + $0x8] sm:$0xff]  }
 0x375   : > { %v1350_v23 = vmul.f32 1.442695, %v1344_v22 }
 0x377   : > { %2338 = vpow2.f32 %v1350_v23 }
 0x37c   : > { %v2337_v24 = vpop.eup %2336 }
 0x37d   : > { %v1354_v25 = vsel %vm1130_vm2, %v2337_v24, 0.0 }
 0x37e   : > { %1355 = vadd.xlane.f32.xlu0 %v1354_v25 }
 0x384   : > { %v2339_v26 = vpop.eup %2338 }
 0x385   : > { %v1360_v27 = vsel %vm1130_vm2, %v2339_v26, 0.0 }
 0x386   : > { %1361 = vadd.xlane.f32.xlu0 %v1360_v27 }
 0x38a   : > { %v1335_v28 = vpop.xlane.xlu1 %1334 }
 0x38b   : > { %v1343_v29 = vsub.f32 %v1327_v5, %v1335_v28 }
 0x38d   : > { %v1348_v30 = vmul.f32 1.442695, %v1343_v29 }
 0x38f   : > { %2340 = vpow2.f32 %v1348_v30  ;;  %v2324_v30 = vld [vmem:[%s2891_s8 + $0x8] sm:$0xff]  }
 0x392   : > { %v1341_v31 = vpop.xlane.xlu1 %1340 }
 0x393   : > { %v1345_v32 = vsub.f32 %v1329_v13, %v1341_v31  ;;  %v2326_v31 = vld [vmem:[%s2893_s10 + $0x38] sm:$0xff]  }
 0x395   : > { %v1352_v33 = vmul.f32 1.442695, %v1345_v32  ;;  %v2327_v32 = vld [vmem:[%s2893_s10 + $0x30] sm:$0xff]  }
 0x397   : > { %2342 = vpow2.f32 %v1352_v33  ;;  %v2328_v33 = vld [vmem:[%s2893_s10 + $0x28] sm:$0xff]  }
 0x39c   : > { %v2341_v34 = vpop.eup %2340 }
 0x39d   : > { %v1357_v35 = vsel %vm1130_vm2, %v2341_v34, 0.0 }
 0x39e   : > { %1358 = vadd.xlane.f32.xlu1 %v1357_v35  ;;  %v2330_v35 = vld [vmem:[%s2893_s10 + $0x18] sm:$0xff]  }
 0x3a4   : > { %v2343_v36 = vpop.eup %2342 }
 0x3a5   : > { %v1363_v37 = vsel %vm1130_vm2, %v2343_v36, 0.0 }
 0x3a6   : > { %1364 = vadd.xlane.f32.xlu1 %v1363_v37 }
 0x407   : > { %v1356_v38 = vpop.xlane.xlu0 %1355 }
 0x408   : > { %2344 = vrcp.f32 %v1356_v38 }
 0x40f   : > { %v1362_v39 = vpop.xlane.xlu0 %1361 }
 0x410   : > { %2346 = vrcp.f32 %v1362_v39 }
 0x415   : > { %v2345_v40 = vpop.eup %2344 }
 0x416   : > { %v1370_v41 = vmul.f32 %v2345_v40, %v2337_v24 }
 0x418   : > { %v1374_v42 = vpack.c.bf16 %v1370_v41, %v1370_v41  ;;  %v1988_v41 = vld [vmem:[%s2889_s6] ss:$0 sm:$0xff] }
 0x41a   : > { %2197 = vmatmul.mubr.msk.bf16.vlgmr.msra.gmra.mxu0 %vm1130_vm2, %v1374_v42 }
 0x41b   : > { %2207 = vmatpush3.bf16.msra.mxu0 %v2717_v17  ;;  %2208 = vmatprep.mubr.msk.bf16.mxu0 %vm2417_vm1, %v2416_v9 }
 0x41c   : > { %2218 = vmatprep.subr.bf16.mxu0 %v2416_v9 }
 0x41d   : > { %v2347_v43 = vpop.eup %2346 }
 0x41e   : > { %v1372_v44 = vmul.f32 %v2347_v43, %v2339_v26  ;;  %v1989_v43 = vld [vmem:[%s2890_s7] ss:$0 sm:$0xff] }
 0x420   : > { %v1376_v46 = vpack.c.bf16 %v1372_v44, %v1372_v44 }
 0x422   : > { %2209 = vmatmul.mubr.msk.bf16.vlgmr.msra.gmra.mxu0 %vm1130_vm2, %v1376_v46 }
 0x423   : > { %2222 = vmatprep.mubr.msk.bf16.mxu0 %vm2417_vm1, %v2416_v9  ;;  %2219 = vmatpush3.bf16.msra.mxu0 %v2322_v61 }
 0x424   : > { %2220 = vmatprep.subr.bf16.mxu0 %v2416_v9 }
 0x427   : > { %v1359_v47 = vpop.xlane.xlu1 %1358  ;;  %2221 = vmatpush3.bf16.msra.mxu0 %v2323_v62 }
 0x428   : > { %2348 = vrcp.f32 %v1359_v47  ;;  %2234 = vmatprep.subr.bf16.mxu0 %v2416_v9 }
 0x42f   : > { %v1365_v48 = vpop.xlane.xlu1 %1364 }
 0x430   : > { %2350 = vrcp.f32 %v1365_v48  ;;  %v2332_v48 = vld [vmem:[%s2893_s10 + $0x8] sm:$0xff]  }
 0x435   : > { %v2349_v49 = vpop.eup %2348 }
 0x436   : > { %v1371_v50 = vmul.f32 %v2349_v49, %v2341_v34  ;;  %v2329_v34 = vld [vmem:[%s2893_s10 + $0x20] sm:$0xff]  }
 0x437   : > { %v2333_v49 = vld [vmem:[%s2893_s10] sm:$0xff]  }
 0x438   : > { %v1375_v17 = vpack.c.bf16 %v1371_v50, %v1371_v50  ;;  %v1990_v50 = vld [vmem:[%s2892_s9] ss:$0 sm:$0xff] }
 0x43a   : > { %2203 = vmatmul.mubr.msk.bf16.vlgmr.msra.gmra.mxu1 %vm1130_vm2, %v1375_v17 }
 0x43b   : > { %2213 = vmatpush3.bf16.msra.mxu1 %v2732_v45  ;;  %2214 = vmatprep.mubr.msk.bf16.mxu1 %vm2417_vm1, %v2416_v9 }
 0x43c   : > { %2226 = vmatprep.subr.bf16.mxu1 %v2416_v9 }
 0x43d   : > { %v2351_v51 = vpop.eup %2350 }
 0x43e   : > { %v1373_v52 = vmul.f32 %v2351_v51, %v2343_v36  ;;  %v2331_v36 = vld [vmem:[%s2893_s10 + $0x10] sm:$0xff]  }
 0x440   : > { %v1377_v53 = vpack.c.bf16 %v1373_v52, %v1373_v52 }
 0x442   : > { %2215 = vmatmul.mubr.msk.bf16.vlgmr.msra.gmra.mxu1 %vm1130_vm2, %v1377_v53 }
 0x443   : > { %2230 = vmatprep.mubr.msk.bf16.mxu1 %vm2417_vm1, %v2416_v9  ;;  %2227 = vmatpush3.bf16.msra.mxu1 %v2324_v30 }
 0x444   : > { %2228 = vmatprep.subr.bf16.mxu1 %v2416_v9 }
 0x4da   : > { %v1419_v54 = vpop.f32.mrf.mxu0 }
 0x4dc   : > { %v2198_v55 = vpop.f32.mrf.mxu0 }
 0x4de   : > { %v1422_v56 = vpop.f32.mrf.mxu0 }
 0x4e0   : > { %v2199_v57 = vpop.f32.mrf.mxu0 }
 0x4e2   : > { %v1511_v58 = vpop.f32.mrf.mxu0 }
 0x4e3   : > { %1568 = vrot.lane.b32.xlu1 %v1511_v58, %s2418_s18  ;;  %s1936_s18 = sshll.u32 %s402_s17, 3 }
 0x4e4   : > { %v2210_v45 = vpop.f32.mrf.mxu0  ;;  %s404_s28 = scalar_lea.vmem [#allocation2], %s1936_s18 }
 0x4e6   : > { %v1514_v59 = vpop.f32.mrf.mxu0 }
 0x4e8   : > { %v2211_v60 = vpop.f32.mrf.mxu0 }
 0x4fa   : > { %v1465_v63 = vpop.f32.mrf.mxu1 }
 0x4fb   : > { %1564 = vrot.lane.b32.xlu0 %v1465_v63, %s2419_s29  ;;  %s1873_s29 = sshll.u32 %s404_s28, 4  ;;  %s2843_s29 = int_to_ptr.vmem [resolvable:$true] %s1873_s29 }
 0x4fc   : > { %v2204_v1 = vpop.f32.mrf.mxu1  ;;  %s2354_s18 = scalar_lea.vmem %s2843_s29, 128  ;;  %p2361_p0 = scmp.lt.s32.totalorder %s2843_s29, %s2359_s20 }
 0x4fd   : > { %p2355_p11 = scmp.ne.s32.totalorder %s2843_s29, %s2354_s18  ;;  %p2362_p1 = scmp.lt.s32.totalorder %s2360_s26, %s2354_s18 }
 0x4fe   : > { %v1468_v2 = vpop.f32.mrf.mxu1 }
 0x4ff   : > { %p2356_p12 = pnand %p2355_p11, %p2525_p5  ;;  %p2363_p2 = por %p2362_p1, %p2361_p0 }
 0x500   : > { %v2205_v3 = vpop.f32.mrf.mxu1 }
 0x501   : > { %p2357_p13 = pneg %p2356_p12 }
 0x502   : > { %v1557_v4 = vpop.f32.mrf.mxu1 }
 0x503   : > { %1572 = vrot.lane.b32.xlu1 %v1557_v4, %s2420_s15  ;;  %p2364_p3 = pnand %p2363_p2, %p2357_p13 }
 0x504   : > { %v2216_v5 = vpop.f32.mrf.mxu1 }
 0x506   : > { %v1560_v6 = vpop.f32.mrf.mxu1 }
 0x508   : > { %v2217_v7 = vpop.f32.mrf.mxu1 }
 0x555   : > { %v1569_v10 = vpop.permute.xlu1 %1568 }
 0x56d   : > { %v1565_v8 = vpop.permute.xlu0 %1564 }
 0x56e   : > { %v1575_v11 = vsel %vm1130_vm2, %v1419_v54, %v1565_v8 }
 0x56f   : > { %v1577_v12 = vsel %vm1576_vm5, %v1575_v11, %v1569_v10 }
 0x575   : > { %v1573_v13 = vpop.permute.xlu1 %1572 }
 0x576   : > { %v1579_v14 = vsel %vm1578_vm6, %v1577_v12, %v1573_v13 }
 0x577   : > { %v1580_v15 = vpack.c.bf16 %v1579_v14, %v1579_v14 }
 0x579   : > { %2223 = vmatmul.mubr.msk.bf16.vlgmr.msra.gmra.mxu0 %vm413_vm0, %v1580_v15 }
 0x57a   : > { %2250 = vmatprep.mubr.msk.bf16.mxu0 %vm2417_vm1, %v2416_v9  ;;  %2235 = vmatpush3.bf16.msra.mxu0 %v2326_v31 }
 0x57b   : > { %2236 = vmatprep.subr.bf16.mxu0 %v2416_v9 }
 0x57e   : > { %2237 = vmatpush3.bf16.msra.mxu0 %v2327_v32 }
 0x57f   : > { %2238 = vmatprep.subr.bf16.mxu0 %v2416_v9 }
 0x582   : > { %2239 = vmatpush3.bf16.msra.mxu0 %v2328_v33 }
 0x583   : > { %2240 = vmatprep.subr.bf16.mxu0 %v2416_v9 }
 0x586   : > { %2241 = vmatpush3.bf16.msra.mxu0 %v2329_v34 }
 0x587   : > { %2242 = vmatprep.subr.bf16.mxu0 %v2416_v9 }
 0x58a   : > { %2243 = vmatpush3.bf16.msra.mxu0 %v2330_v35 }
 0x58b   : > { %2244 = vmatprep.subr.bf16.mxu0 %v2416_v9 }
 0x58e   : > { %2245 = vmatpush3.bf16.msra.mxu0 %v2331_v36 }
 0x58f   : > { %2246 = vmatprep.subr.bf16.mxu0 %v2416_v9 }
 0x592   : > { %2247 = vmatpush3.bf16.msra.mxu0 %v2332_v48 }
 0x593   : > { %2248 = vmatprep.subr.bf16.mxu0 %v2416_v9  ;;  %v1994_v9 = vld [vmem:[%s2894_s11] ss:$0 sm:$0xff] }
 0x596   : > { %2249 = vmatpush3.bf16.msra.mxu0 %v2333_v49 }
 0x639   : > { %v1641_v18 = vpop.f32.mrf.mxu0 }
 0x63a   : > { %v1642_v19 = vadd.f32 %v1984_v16, %v1641_v18 }
 0x63b   : > { %v2224_v20 = vpop.f32.mrf.mxu0 }
 0x63c   : > { %v2778_v21 = vadd.f32 %v1642_v19, %v2540_v0  ;;  %v2325_v0 = vld [vmem:[%s2891_s8] sm:$0xff]  }
 0x63d   : > { %v1644_v22 = vpop.f32.mrf.mxu0  ;;  %2229 = vmatpush3.bf16.msra.mxu1 %v2325_v0 }
 0x63e   : > { %v1650_v23 = vsel %vm413_vm0, %v2778_v21, 0.0 }
 0x63f   : > { %1651 = vadd.xlane.f32.xlu1 %v1650_v23  ;;  %v2225_v24 = vpop.f32.mrf.mxu0 }
 0x6c8   : > { %v1652_v25 = vpop.xlane.xlu1 %1651 }
 0x6c9   : > { %v1653_v26 = vmul.f32 0.03125, %v1652_v25 }
 0x6cb   : > { %v1654_v27 = vsub.f32 %v2778_v21, %v1653_v26 }
 0x6cd   : > { %v1655_v28 = vmul.f32 %v1654_v27, %v1654_v27 }
 0x6cf   : > { %v1656_v29 = vsel %vm413_vm0, %v1655_v28, 0.0 }
 0x6d0   : > { %1657 = vadd.xlane.f32.xlu0 %v1656_v29 }
 0x759   : > { %v1658_v37 = vpop.xlane.xlu0 %1657 }
 0x75a   : > { %v1659_v38 = vmul.f32 0.03125, %v1658_v37 }
 0x75c   : > { %v1660_v39 = vadd.f32 1e-05, %v1659_v38 }
 0x75e   : > { %2352 = vrsqrt.f32 %v1660_v39 }
 0x76b   : > { %v2353_v40 = vpop.eup %2352 }
 0x76c   : > { %v1662_v42 = vmul.f32 %v2353_v40, %v1654_v27 }
 0x76e   : > { %v1669_v44 = vmul.f32 %v1988_v41, %v1662_v42 }
 0x770   : > { %v1676_v46 = vadd.f32 %v1989_v43, %v1669_v44 }
 0x772   : > { %v1677_v47 = vpack.c.bf16 %v1676_v46, %v1676_v46 }
 0x774   : > { %2231 = vmatmul.mubr.msk.bf16.vlgmr.msra.gmra.mxu1 %vm413_vm0, %v1677_v47 }
 0x834   : > { %v1738_v17 = vpop.f32.mrf.mxu1 }
 0x835   : > { %v1739_v51 = vadd.f32 %v1990_v50, %v1738_v17 }
 0x836   : > { %v2232_v52 = vpop.f32.mrf.mxu1 }
 0x837   : > { %v1744_v53 = vmax.f32 %v1739_v51, 0.0 }
 0x838   : > { %v1741_v54 = vpop.f32.mrf.mxu1 }
 0x839   : > { %v1745_v55 = vpack.c.bf16 %v1744_v53, %v1744_v53 }
 0x83a   : > { %v2233_v56 = vpop.f32.mrf.mxu1 }
 0x83b   : > { %2251 = vmatmul.mubr.bf16.vlgmr.msra.gmra.mxu0 %v1745_v55 }
 0x8fb   : > { %v1851_v57 = vpop.f32.mrf.mxu0 }
 0x8fc   : > { %v1852_v58 = vadd.f32 %v1994_v9, %v1851_v57 }
 0x8fd   : > { %v2252_v45 = vpop.f32.mrf.mxu0 }
 0x8fe   : > { %v1857_v59 = vadd.f32 %v1852_v58, %v2778_v21 }
 0x8ff   : > { %v1854_v60 = vpop.f32.mrf.mxu0 }
 0x900   : > { %1858 = vst.msk [vmem:[%s404_s28] sm:$0xff] %vm413_vm0, %v1857_v59 }
 0x901   : > { %v2253_v61 = vpop.f32.mrf.mxu0 }
 0x902   : > { %2367 = shalt.err (!%p2364_p3)
}
 0x903   : > { %s2368_s28 = scalar_lea.hbm %s2841_s0, 128  ;;  %s2372_s16 = scalar_lea.hbm %s2895_s12, 256 }
 0x904   : > { %p2369_p4 = scmp.ne.s32.totalorder %s2841_s0, %s2368_s28  ;;  %p2373_p9 = scmp.lt.s32.totalorder %s2841_s0, %s2895_s12 }
 0x905   : > { %p2374_p10 = scmp.lt.s32.totalorder %s2372_s16, %s2368_s28 }
 0x906   : > { %p2370_p7 = pnand %p2369_p4, %p2525_p5 }
 0x907   : > { %p2375_p11 = por %p2374_p10, %p2373_p9 }
 0x908   : > { %p2371_p8 = pneg %p2370_p7 }
 0x90a   : > { %p2376_p12 = pnand %p2375_p11, %p2371_p8 }
 0x90c   : > { %2379 = shalt.err (!%p2376_p12)
}
 0x90d   : > { %2254 = dma.vmem_to_hbm [thread:$0]  (%p2525_p5), %s2843_s29, 128, %s2841_s0, %s1860_s25  }
 0x90e PF: > { %p2260_p13 = scmp.ge.s32.totalorder %s2414_s24, 2  ;;  %s1885_s18 = sand.u32 1, %s2402_s21  }
 0x90f   : > { %s1886_s1 = scalar_lea.sflag [#allocation3], %s1885_s18 }
 0x910   : > { %p2257_p0 = pnand %p2260_p13, %p2529_p6 }
 0x912   : > { %p2258_p1 = pneg %p2257_p0 }
 0x914   : > { %2397 = dma.done.wait (%p2258_p1), %s1886_s1, 128  }
 0x915   : > { %2399 = vsyncadd (%p2258_p1), %s1886_s1, 4294967168  ;;  %p22_p2 = scmp.ge.s32.totalorder %s2512_s27, 4   ;;  %s2902_s21 = smov %s2406_s22 }
 0x916   : > { %s2903_s22 = smov %s2410_s23  ;;  %s2904_s23 = smov %s2523_s30 }
 0x917   : > { %s2905_s24 = smov %s2512_s27  ;;  %24 = sbr.rel (!%p22_p2) target bundleno = 6 (0x6), region = 103 }
 0x91c   :  { %1891 = vsyncpa [#allocation3], 1 }
 0x91d   :  { %1893 = vsyncpa [#allocation3 + $0x1], 1 }

</bundles_post_ra>
